<compile_context>
chip_gen: v6e
topology: v6e:2x2x1
jax: 0.10.0
libtpu: 0.0.40
codegen_flags: <defaults>
</compile_context>

<pallas_src>
import math

import jax
import jax.numpy as jnp
from jax.experimental import pallas as pl
from jax.experimental.pallas import tpu as pltpu


# ----------------------------------------------------------------------------
# helpers
# ----------------------------------------------------------------------------
def _round_up(x, m):
    return (x + m - 1) // m * m


def _pick_tile(extent, candidates):
    for t in candidates:
        if extent % t == 0:
            return t
    return extent


# ----------------------------------------------------------------------------
# Kernel 1: per-image conv-as-matmul  y[n]^T = W (Op,K) @ patches[n]^T (K,HW)
#   bf16 MXU inputs, f32 accumulation, fused epilogue:
#     * bias add (output stored as bf16),
#     * per-(image, hw-tile, channel) BN partial stats on the PRE-bias
#       accumulator (zero-padded lanes/channels contribute nothing).
# ----------------------------------------------------------------------------
def _conv_bias_stats_kernel(w_ref, p_ref, bias_ref, y_ref, ssum_ref, ssq_ref,
                            acc_ref):
    k = pl.program_id(3)

    @pl.when(k == 0)
    def _():
        acc_ref[...] = jnp.zeros_like(acc_ref)

    acc_ref[...] += jnp.dot(w_ref[...], p_ref[0],
                            preferred_element_type=jnp.float32)

    @pl.when(k == pl.num_programs(3) - 1)
    def _():
        acc = acc_ref[...]
        y_ref[0] = (acc + bias_ref[...]).astype(y_ref.dtype)          # fused bias
        ssum_ref[...] = jnp.sum(acc, axis=1, keepdims=True).reshape(ssum_ref.shape)
        ssq_ref[...] = jnp.sum(acc * acc, axis=1, keepdims=True).reshape(ssq_ref.shape)


def conv_matmul_with_stats(patches_t, w_t, bias_col):
    """patches_t (N, Kp, HWp) bf16, w_t (Op, Kp) bf16, bias_col (Op, 1) f32.

    Returns (y, ssum, ssq): y is (N, Op, HWp) bf16 conv output (bias included);
    ssum/ssq are (N, hw_tiles, Op, 1) f32 partial BN stats of the pre-bias
    conv output.
    """
    n, kp, hwp = patches_t.shape
    op, kp2 = w_t.shape
    assert kp == kp2

    TO = op if op <= 512 else _pick_tile(op, (512, 256, 128, 64, 32, 16))
    THW = _pick_tile(hwp, (512, 256, 128))
    TK = kp if kp <= 2048 else _pick_tile(kp, (256, 128))

    # v7x megacore: prefer >= 2 parallel blocks when the problem allows it.
    if n * (op // TO) * (hwp // THW) < 2 and THW >= 256:
        THW //= 2

    o_t, hw_t, k_t = op // TO, hwp // THW, kp // TK

    y, ssum, ssq = pl.pallas_call(
        _conv_bias_stats_kernel,
        out_shape=(jax.ShapeDtypeStruct((n, op, hwp), jnp.bfloat16),
                   jax.ShapeDtypeStruct((n, hw_t, op, 1), jnp.float32),
                   jax.ShapeDtypeStruct((n, hw_t, op, 1), jnp.float32)),
        grid_spec=pltpu.PrefetchScalarGridSpec(
            num_scalar_prefetch=0,
            grid=(n, o_t, hw_t, k_t),
            in_specs=[pl.BlockSpec((TO, TK), lambda b, i, j, k: (i, k)),
                      pl.BlockSpec((1, TK, THW), lambda b, i, j, k: (b, k, j)),
                      pl.BlockSpec((TO, 1), lambda b, i, j, k: (i, 0))],
            out_specs=[pl.BlockSpec((1, TO, THW), lambda b, i, j, k: (b, i, j)),
                       pl.BlockSpec((1, 1, TO, 1), lambda b, i, j, k: (b, j, i, 0)),
                       pl.BlockSpec((1, 1, TO, 1), lambda b, i, j, k: (b, j, i, 0))],
            scratch_shapes=[pltpu.VMEM((TO, THW), jnp.float32)]),
        compiler_params=pltpu.CompilerParams(
            dimension_semantics=("parallel", "parallel", "parallel", "arbitrary"),
            vmem_limit_bytes=32 * 1024 * 1024),
    )(w_t, patches_t, bias_col)
    return y, ssum, ssq


# ----------------------------------------------------------------------------
# Kernel 2: tiled per-channel affine (folded BatchNorm) + ReLU, bf16 in / f32 out.
# Channels live on the sublane axis, H*W lane-dense -> output is already NCHW.
# ----------------------------------------------------------------------------
def _bn_relu_kernel(y_ref, scale_ref, shift_ref, o_ref):
    o_ref[0] = jnp.maximum(
        y_ref[0].astype(jnp.float32) * scale_ref[...] + shift_ref[...], 0.0)


def bn_relu(y, scale_col, shift_col):
    n, op, hwp = y.shape
    TO = op if op <= 1024 else _pick_tile(op, (1024, 512, 256, 128, 64, 32, 16))
    THW = _pick_tile(hwp, (1024, 512, 256, 128))
    if n * (op // TO) * (hwp // THW) < 2 and THW >= 256:
        THW //= 2
    o_t, hw_t = op // TO, hwp // THW

    return pl.pallas_call(
        _bn_relu_kernel,
        out_shape=jax.ShapeDtypeStruct((n, op, hwp), jnp.float32),
        grid_spec=pltpu.PrefetchScalarGridSpec(
            num_scalar_prefetch=0,
            grid=(n, o_t, hw_t),
            in_specs=[pl.BlockSpec((1, TO, THW), lambda b, i, j: (b, i, j)),
                      pl.BlockSpec((TO, 1), lambda b, i, j: (i, 0)),
                      pl.BlockSpec((TO, 1), lambda b, i, j: (i, 0))],
            out_specs=pl.BlockSpec((1, TO, THW), lambda b, i, j: (b, i, j))),
        compiler_params=pltpu.CompilerParams(
            dimension_semantics=("parallel", "parallel", "parallel"),
            vmem_limit_bytes=32 * 1024 * 1024),
    )(y, scale_col, shift_col)


# ----------------------------------------------------------------------------
# channel-major im2col glue (3x3, stride 1, pad 1) -- plain bf16 JAX plumbing.
# Produces (N, Kp, H*W[p]) with row index = (dh*3+dw)*Ci + ci.
# ----------------------------------------------------------------------------
def _im2col_t_3x3_pad1(x_nchw_bf16, kp, hwp):
    n, c, h, w = x_nchw_bf16.shape
    hw = h * w
    xp = jnp.pad(x_nchw_bf16, ((0, 0), (0, 0), (1, 1), (1, 1)))
    taps = [xp[:, :, i:i + h, j:j + w].reshape(n, c, hw)
            for i in range(3) for j in range(3)]
    k = 9 * c
    if kp > k:                                   # fold K padding into the concat
        taps.append(jnp.zeros((n, kp - k, hw), x_nchw_bf16.dtype))
    pt = jnp.concatenate(taps, axis=1)           # (N, Kp, HW)
    if hwp > hw:
        pt = jnp.pad(pt, ((0, 0), (0, 0), (0, hwp - hw)))
    return pt


# ----------------------------------------------------------------------------
# ConvbnRelu forward: conv3x3(pad=1, bias) -> BatchNorm2d (train batch stats) -> ReLU
# ----------------------------------------------------------------------------
def convbnrelu_forward(params, x_nchw, eps=1e-5):
    w, b = params["conv_w"], params["conv_b"]            # (O, I, 3, 3), (O,)
    gamma, beta = params["bn_g"], params["bn_b"]         # (O,), (O,)
    cout, cin, kh, kw = w.shape
    n, _, h, wd = x_nchw.shape
    hw = h * wd
    m = n * hw
    k = kh * kw * cin

    op = _round_up(cout, 16)
    hwp = _round_up(hw, 128)
    kp16 = _round_up(k, 16)
    if kp16 <= 2048:
        kp = kp16                                # single full-K block, no 128 waste
    else:
        kp = (_round_up(k, 256)
              if _round_up(k, 256) == _round_up(k, 128) else _round_up(k, 128))

    # bf16 channel-major patches (no NHWC transpose, no separate cast pass).
    patches_t = _im2col_t_3x3_pad1(x_nchw.astype(jnp.bfloat16), kp, hwp)

    w_t = jnp.transpose(w, (0, 2, 3, 1)).reshape(cout, k).astype(jnp.bfloat16)
    w_t = jnp.pad(w_t, ((0, op - cout), (0, kp - k)))
    bias_col = jnp.pad(b, (0, op - cout)).astype(jnp.float32).reshape(op, 1)

    y, ssum, ssq = conv_matmul_with_stats(patches_t, w_t, bias_col)

    # Finalize BN batch statistics (tiny per-channel vectors; plain JAX).
    s = jnp.sum(ssum[..., 0], axis=(0, 1))                 # pre-bias sums
    sq = jnp.sum(ssq[..., 0], axis=(0, 1))
    mean_pre = s / m
    var = jnp.maximum(sq / m - mean_pre * mean_pre, 0.0)   # biased (train mode)
    mean = mean_pre + bias_col[:, 0]                       # bias shifts mean only

    gamma_p = jnp.pad(gamma, (0, op - cout)).astype(jnp.float32)
    beta_p = jnp.pad(beta, (0, op - cout)).astype(jnp.float32)
    scale = gamma_p * jax.lax.rsqrt(var + eps)
    shift = beta_p - mean * scale

    out = bn_relu(y, scale.reshape(op, 1), shift.reshape(op, 1))
    # Channel-major == NCHW; the slices are no-ops when cout%16==0 and hw%128==0.
    return out[:, :cout, :hw].reshape(n, cout, h, wd)


# ----------------------------------------------------------------------------
# pure-JAX reference (f32) for a tolerance check
# ----------------------------------------------------------------------------
def convbnrelu_reference(params, x_nchw, eps=1e-5):
    w, b = params["conv_w"], params["conv_b"]
    gamma, beta = params["bn_g"], params["bn_b"]
    y = jax.lax.conv_general_dilated(
        x_nchw.astype(jnp.float32), w.astype(jnp.float32),
        window_strides=(1, 1), padding=((1, 1), (1, 1)),
        dimension_numbers=("NCHW", "OIHW", "NCHW"))
    y = y + b.reshape(1, -1, 1, 1)
    mean = jnp.mean(y, axis=(0, 2, 3), keepdims=True)
    var = jnp.mean(jnp.square(y - mean), axis=(0, 2, 3), keepdims=True)
    yn = (y - mean) * jax.lax.rsqrt(var + eps)
    yn = yn * gamma.reshape(1, -1, 1, 1) + beta.reshape(1, -1, 1, 1)
    return jnp.maximum(yn, 0.0)


# ----------------------------------------------------------------------------
# deterministic synthetic parameter init (shapes follow the module __init__)
# ----------------------------------------------------------------------------
def init_params(key, cin, cout):
    k1, k2, k3, k4 = jax.random.split(key, 4)
    return {
        "conv_w": jax.random.normal(k1, (cout, cin, 3, 3), jnp.float32)
                  * math.sqrt(2.0 / (cin * 9)),
        "conv_b": 0.05 * jax.random.normal(k2, (cout,), jnp.float32),
        "bn_g": 1.0 + 0.05 * jax.random.normal(k3, (cout,), jnp.float32),
        "bn_b": 0.05 * jax.random.normal(k4, (cout,), jnp.float32),
    }


if __name__ == "__main__":
    N, CIN, H, W = 2, 4, 16, 16
    COUT = 32

    kx, kp = jax.random.split(jax.random.PRNGKey(0))
    x = jax.random.normal(kx, (N, CIN, H, W), jnp.float32)
    params = init_params(kp, CIN, COUT)

    out = jax.jit(convbnrelu_forward)(params, x)
    out = jax.block_until_ready(out)

    assert out.shape == (N, COUT, H, W)
    assert bool(jnp.all(jnp.isfinite(out)))

    ref = convbnrelu_reference(params, x)
    max_err = float(jnp.max(jnp.abs(out - ref)))
    # bf16 MXU inputs with f32 accumulation: small, bounded deviation from f32 ref.
    assert max_err < 2e-1, f"max abs error vs reference: {max_err}"

    print("KERNEL_OK")
</pallas_src>

<mosaic_0001>
module attributes {stable_mosaic.version = 11 : i64} {
  func.func @_conv_bias_stats_kernel(%arg0: i32, %arg1: i32, %arg2: i32, %arg3: i32, %arg4: memref<32x48xbf16, #tpu.memory_space<vmem>>, %arg5: memref<1x48x256xbf16, #tpu.memory_space<vmem>>, %arg6: memref<32x1xf32, #tpu.memory_space<vmem>>, %arg7: memref<1x32x256xbf16, #tpu.memory_space<vmem>>, %arg8: memref<1x1x32x1xf32, #tpu.memory_space<vmem>>, %arg9: memref<1x1x32x1xf32, #tpu.memory_space<vmem>>, %arg10: memref<32x256xf32, #tpu.memory_space<vmem>>) attributes {dimension_semantics = [#tpu.dimension_semantics<parallel>, #tpu.dimension_semantics<parallel>, #tpu.dimension_semantics<parallel>, #tpu.dimension_semantics<arbitrary>], iteration_bounds = array<i64: 2, 1, 1, 1>, scalar_prefetch = 0 : i64, scratch_operands = 1 : i64, tpu.core_type = #tpu.core_type<tc>, window_params = [{transform_indices = @transform_0, window_bounds = array<i64: 32, 48>}, {transform_indices = @transform_1, window_bounds = array<i64: 1, 48, 256>}, {transform_indices = @transform_2, window_bounds = array<i64: 32, 1>}, {transform_indices = @transform_3, window_bounds = array<i64: 1, 32, 256>}, {transform_indices = @transform_4, window_bounds = array<i64: 1, 1, 32, 1>}, {transform_indices = @transform_5, window_bounds = array<i64: 1, 1, 32, 1>}]} {
    %c0_i32 = arith.constant 0 : i32
    %0 = arith.cmpi eq, %arg3, %c0_i32 : i32
    %1 = arith.extui %0 : i1 to i32
    %c0_i32_0 = arith.constant 0 : i32
    %2 = arith.cmpi ne, %1, %c0_i32_0 : i32
    scf.if %2 {
      %cst_11 = arith.constant 0.000000e+00 : f32
      %13 = vector.broadcast %cst_11 : f32 to vector<32x256xf32>
      %c0_12 = arith.constant 0 : index
      %c0_13 = arith.constant 0 : index
      %14 = vector.load %arg10[%c0_12, %c0_13] : memref<32x256xf32, #tpu.memory_space<vmem>>, vector<32x256xf32>
      tpu.vector_store %arg10[%c0_12, %c0_13], %13 {strides = array<i32>} : memref<32x256xf32, #tpu.memory_space<vmem>>, vector<32x256xf32>,
    } else {
    }
    %c0 = arith.constant 0 : index
    %c0_1 = arith.constant 0 : index
    %3 = vector.load %arg10[%c0, %c0_1] : memref<32x256xf32, #tpu.memory_space<vmem>>, vector<32x256xf32>
    %c0_2 = arith.constant 0 : index
    %c0_3 = arith.constant 0 : index
    %4 = vector.load %arg4[%c0_2, %c0_3] : memref<32x48xbf16, #tpu.memory_space<vmem>>, vector<32x48xbf16>
    %c0_4 = arith.constant 0 : index
    %c0_5 = arith.constant 0 : index
    %c0_6 = arith.constant 0 : index
    %5 = vector.load %arg5[%c0_4, %c0_5, %c0_6] : memref<1x48x256xbf16, #tpu.memory_space<vmem>>, vector<1x48x256xbf16>
    %6 = vector.shape_cast %5 : vector<1x48x256xbf16> to vector<48x256xbf16>
    %cst = arith.constant dense<0.000000e+00> : vector<32x256xf32>
    %7 = tpu.matmul %4, %6, %cst {dimension_numbers = #tpu.dot_dimension_numbers<[1], [0], [0], [1], [0, 0, 1, 1], [], []>} : vector<32x48xbf16>, vector<48x256xbf16>, vector<32x256xf32> -> vector<32x256xf32>
    %8 = arith.addf %3, %7 : vector<32x256xf32>
    %c0_7 = arith.constant 0 : index
    %c0_8 = arith.constant 0 : index
    %9 = vector.load %arg10[%c0_7, %c0_8] : memref<32x256xf32, #tpu.memory_space<vmem>>, vector<32x256xf32>
    tpu.vector_store %arg10[%c0_7, %c0_8], %8 {strides = array<i32>} : memref<32x256xf32, #tpu.memory_space<vmem>>, vector<32x256xf32>,
    %c0_i32_9 = arith.constant 0 : i32
    %10 = arith.cmpi eq, %arg3, %c0_i32_9 : i32
    %11 = arith.extui %10 : i1 to i32
    %c0_i32_10 = arith.constant 0 : i32
    %12 = arith.cmpi ne, %11, %c0_i32_10 : i32
    scf.if %12 {
      %c0_11 = arith.constant 0 : index
      %c0_12 = arith.constant 0 : index
      %13 = vector.load %arg10[%c0_11, %c0_12] : memref<32x256xf32, #tpu.memory_space<vmem>>, vector<32x256xf32>
      %c0_13 = arith.constant 0 : index
      %c0_14 = arith.constant 0 : index
      %14 = vector.load %arg6[%c0_13, %c0_14] : memref<32x1xf32, #tpu.memory_space<vmem>>, vector<32x1xf32>
      %15 = vector.broadcast %14 : vector<32x1xf32> to vector<32x256xf32>
      %16 = arith.addf %13, %15 : vector<32x256xf32>
      %17 = arith.truncf %16 : vector<32x256xf32> to vector<32x256xbf16>
      %c0_15 = arith.constant 0 : index
      %c0_16 = arith.constant 0 : index
      %c0_17 = arith.constant 0 : index
      %18 = vector.load %arg7[%c0_15, %c0_16, %c0_17] : memref<1x32x256xbf16, #tpu.memory_space<vmem>>, vector<1x32x256xbf16>
      %19 = vector.shape_cast %18 : vector<1x32x256xbf16> to vector<32x256xbf16>
      %20 = vector.shape_cast %17 : vector<32x256xbf16> to vector<1x32x256xbf16>
      tpu.vector_store %arg7[%c0_15, %c0_16, %c0_17], %20 {strides = array<i32>} : memref<1x32x256xbf16, #tpu.memory_space<vmem>>, vector<1x32x256xbf16>,
      %cst_18 = arith.constant dense<0.000000e+00> : vector<32xf32>
      %21 = vector.multi_reduction <add>, %13, %cst_18 [1] : vector<32x256xf32> to vector<32xf32>
      %22 = vector.shape_cast %21 : vector<32xf32> to vector<32x1xf32>
      %23 = vector.shape_cast %22 : vector<32x1xf32> to vector<1x1x32x1xf32>
      %c0_19 = arith.constant 0 : index
      %c0_20 = arith.constant 0 : index
      %c0_21 = arith.constant 0 : index
      %c0_22 = arith.constant 0 : index
      %24 = vector.load %arg8[%c0_19, %c0_20, %c0_21, %c0_22] : memref<1x1x32x1xf32, #tpu.memory_space<vmem>>, vector<1x1x32x1xf32>
      tpu.vector_store %arg8[%c0_19, %c0_20, %c0_21, %c0_22], %23 {strides = array<i32>} : memref<1x1x32x1xf32, #tpu.memory_space<vmem>>, vector<1x1x32x1xf32>,
      %25 = arith.mulf %13, %13 : vector<32x256xf32>
      %cst_23 = arith.constant dense<0.000000e+00> : vector<32xf32>
      %26 = vector.multi_reduction <add>, %25, %cst_23 [1] : vector<32x256xf32> to vector<32xf32>
      %27 = vector.shape_cast %26 : vector<32xf32> to vector<32x1xf32>
      %28 = vector.shape_cast %27 : vector<32x1xf32> to vector<1x1x32x1xf32>
      %c0_24 = arith.constant 0 : index
      %c0_25 = arith.constant 0 : index
      %c0_26 = arith.constant 0 : index
      %c0_27 = arith.constant 0 : index
      %29 = vector.load %arg9[%c0_24, %c0_25, %c0_26, %c0_27] : memref<1x1x32x1xf32, #tpu.memory_space<vmem>>, vector<1x1x32x1xf32>
      tpu.vector_store %arg9[%c0_24, %c0_25, %c0_26, %c0_27], %28 {strides = array<i32>} : memref<1x1x32x1xf32, #tpu.memory_space<vmem>>, vector<1x1x32x1xf32>,
    } else {
    }
    return
  }
  func.func @transform_0(%arg0: i32, %arg1: i32, %arg2: i32, %arg3: i32) -> (i32, i32) {
    %c0_i32 = arith.constant 0 : i32
    return %arg1, %arg3 : i32, i32
  }
  func.func @transform_1(%arg0: i32, %arg1: i32, %arg2: i32, %arg3: i32) -> (i32, i32, i32) {
    %c0_i32 = arith.constant 0 : i32
    return %arg0, %arg3, %arg2 : i32, i32, i32
  }
  func.func @transform_2(%arg0: i32, %arg1: i32, %arg2: i32, %arg3: i32) -> (i32, i32) {
    %c0_i32 = arith.constant 0 : i32
    %c0_i32_0 = arith.constant 0 : i32
    return %arg1, %c0_i32 : i32, i32
  }
  func.func @transform_3(%arg0: i32, %arg1: i32, %arg2: i32, %arg3: i32) -> (i32, i32, i32) {
    %c0_i32 = arith.constant 0 : i32
    return %arg0, %arg1, %arg2 : i32, i32, i32
  }
  func.func @transform_4(%arg0: i32, %arg1: i32, %arg2: i32, %arg3: i32) -> (i32, i32, i32, i32) {
    %c0_i32 = arith.constant 0 : i32
    %c0_i32_0 = arith.constant 0 : i32
    return %arg0, %arg2, %arg1, %c0_i32 : i32, i32, i32, i32
  }
  func.func @transform_5(%arg0: i32, %arg1: i32, %arg2: i32, %arg3: i32) -> (i32, i32, i32, i32) {
    %c0_i32 = arith.constant 0 : i32
    %c0_i32_0 = arith.constant 0 : i32
    return %arg0, %arg2, %arg1, %c0_i32 : i32, i32, i32, i32
  }
}

module attributes {stable_mosaic.version = 11 : i64} {
  func.func @_bn_relu_kernel(%arg0: i32, %arg1: i32, %arg2: i32, %arg3: memref<1x32x256xbf16, #tpu.memory_space<vmem>>, %arg4: memref<32x1xf32, #tpu.memory_space<vmem>>, %arg5: memref<32x1xf32, #tpu.memory_space<vmem>>, %arg6: memref<1x32x256xf32, #tpu.memory_space<vmem>>) attributes {dimension_semantics = [#tpu.dimension_semantics<parallel>, #tpu.dimension_semantics<parallel>, #tpu.dimension_semantics<parallel>], iteration_bounds = array<i64: 2, 1, 1>, scalar_prefetch = 0 : i64, scratch_operands = 0 : i64, tpu.core_type = #tpu.core_type<tc>, window_params = [{transform_indices = @transform_0, window_bounds = array<i64: 1, 32, 256>}, {transform_indices = @transform_1, window_bounds = array<i64: 32, 1>}, {transform_indices = @transform_2, window_bounds = array<i64: 32, 1>}, {transform_indices = @transform_3, window_bounds = array<i64: 1, 32, 256>}]} {
    %c0 = arith.constant 0 : index
    %c0_0 = arith.constant 0 : index
    %c0_1 = arith.constant 0 : index
    %0 = vector.load %arg3[%c0, %c0_0, %c0_1] : memref<1x32x256xbf16, #tpu.memory_space<vmem>>, vector<1x32x256xbf16>
    %1 = vector.shape_cast %0 : vector<1x32x256xbf16> to vector<32x256xbf16>
    %2 = arith.extf %1 : vector<32x256xbf16> to vector<32x256xf32>
    %c0_2 = arith.constant 0 : index
    %c0_3 = arith.constant 0 : index
    %3 = vector.load %arg4[%c0_2, %c0_3] : memref<32x1xf32, #tpu.memory_space<vmem>>, vector<32x1xf32>
    %4 = vector.broadcast %3 : vector<32x1xf32> to vector<32x256xf32>
    %5 = arith.mulf %2, %4 : vector<32x256xf32>
    %c0_4 = arith.constant 0 : index
    %c0_5 = arith.constant 0 : index
    %6 = vector.load %arg5[%c0_4, %c0_5] : memref<32x1xf32, #tpu.memory_space<vmem>>, vector<32x1xf32>
    %7 = vector.broadcast %6 : vector<32x1xf32> to vector<32x256xf32>
    %8 = arith.addf %5, %7 : vector<32x256xf32>
    %cst = arith.constant 0.000000e+00 : f32
    %9 = vector.broadcast %cst : f32 to vector<32x256xf32>
    %10 = arith.maximumf %8, %9 : vector<32x256xf32>
    %c0_6 = arith.constant 0 : index
    %c0_7 = arith.constant 0 : index
    %c0_8 = arith.constant 0 : index
    %11 = vector.load %arg6[%c0_6, %c0_7, %c0_8] : memref<1x32x256xf32, #tpu.memory_space<vmem>>, vector<1x32x256xf32>
    %12 = vector.shape_cast %11 : vector<1x32x256xf32> to vector<32x256xf32>
    %13 = vector.shape_cast %10 : vector<32x256xf32> to vector<1x32x256xf32>
    tpu.vector_store %arg6[%c0_6, %c0_7, %c0_8], %13 {strides = array<i32>} : memref<1x32x256xf32, #tpu.memory_space<vmem>>, vector<1x32x256xf32>,
    return
  }
  func.func @transform_0(%arg0: i32, %arg1: i32, %arg2: i32) -> (i32, i32, i32) {
    %c0_i32 = arith.constant 0 : i32
    return %arg0, %arg1, %arg2 : i32, i32, i32
  }
  func.func @transform_1(%arg0: i32, %arg1: i32, %arg2: i32) -> (i32, i32) {
    %c0_i32 = arith.constant 0 : i32
    %c0_i32_0 = arith.constant 0 : i32
    return %arg1, %c0_i32 : i32, i32
  }
  func.func @transform_2(%arg0: i32, %arg1: i32, %arg2: i32) -> (i32, i32) {
    %c0_i32 = arith.constant 0 : i32
    %c0_i32_0 = arith.constant 0 : i32
    return %arg1, %c0_i32 : i32, i32
  }
  func.func @transform_3(%arg0: i32, %arg1: i32, %arg2: i32) -> (i32, i32, i32) {
    %c0_i32 = arith.constant 0 : i32
    return %arg0, %arg1, %arg2 : i32, i32, i32
  }
}

</mosaic_0001>

<bundles_post_ra>
// kernel: convbnrelu_forward.3
= control target key start
LH: loop header
LB: loop body
LE: loop exit
PB: predicated region body
PF: predicated region fallthrough
CT: control target
= control target key end

     0   :  { %s617_s12 = smov 0   ;;  %s619_s13 = smov 0   ;;  %s682_s0 = inlined_call_operand.vmem [shape: bf16[2,32,256], index: 0, kind: input, shape index: {}]   ;;  %s683_s1 = inlined_call_operand.vmem [shape: f32[32,1], index: 1, kind: input, shape index: {}]   ;;  %s684_s2 = inlined_call_operand.vmem [shape: f32[32,1], index: 2, kind: input, shape index: {}]   ;;  %s685_s3 = inlined_call_operand.vmem [shape: f32[2,32,256], index: 3, kind: output, shape index: {}]  }
   0x1   :  { %s621_s14 = smov 0  }
   0x2 LB: > { %s32_s15 = sadd.s32 1, %s590_s13  ;;  %p536_p0 = scmp.ge.s32.totalorder %s594_s14, 1  ;;  %s594_s14 = sphi %s621_s14, %s13_s14   ;;  %s590_s13 = sphi %s619_s13, %s687_s13   ;;  %s586_s12 = sphi %s617_s12, %s686_s12  }
   0x3   : > { %p34_p1 = scmp.ge.s32.totalorder %s32_s15, 2  ;;  %p197_p2 = scmp.lt.s32.totalorder %s594_s14, 3 }
   0x5   : > { %s689_s15 = smov (%p34_p1, %s32_s15), 0  ;;  %p198_p3 = pnand %p536_p0, %p197_p2 }
   0x6   : > { %p251_p4 = scmp.lt.s32.totalorder (!%p198_p3), %s586_s12, 1 }
   0x7   : > { %201 = sbr.rel (%p198_p3) target bundleno = 156 (0x9c), region = 32 }
   0xc   : > { %v307_v0 = vld [vmem:[%s683_s1 + $0x10] sm:$0xff]  ;;  %v305_v1 = vld [vmem:[%s683_s1] sm:$0xff]  ;;  %v596_v2 = vmov 0   ;;  %v308_v3 = vld [vmem:[%s683_s1 + $0x18] sm:$0xff]  ;;  %s691_s12 = smov (!%p251_p4, %s586_s12), 1 }
   0xd   : > { %571 = vset.pattern.permute.xlu1 %v596_v2  ;;  %570 = vset.pattern.permute.xlu0 %v596_v2  ;;  %v306_v4 = vld [vmem:[%s683_s1 + $0x8] sm:$0xff]  ;;  %v337_v6 = vld [vmem:[%s684_s2] sm:$0xff]  ;;  %v340_v7 = vld [vmem:[%s684_s2 + $0x18] sm:$0xff]  ;;  %s543_s5 = sshll.u32 %s691_s12, 5  ;;  %s544_s9 = sshll.u32 %s691_s12, 6 }
   0xe   : > { %321 = vperm.xlu1 %571, %v307_v0   ;;  %311 = vperm.xlu0 %570, %v305_v1   ;;  %v338_v5 = vld [vmem:[%s684_s2 + $0x8] sm:$0xff]  ;;  %v339_v8 = vld [vmem:[%s684_s2 + $0x10] sm:$0xff]  ;;  %s262_s8 = scalar_lea.vmem %s682_s0, %s543_s5  ;;  %s290_s16 = scalar_lea.vmem %s685_s3, %s544_s9 }
   0xf   : > { %v293_v11 = vld [vmem:[%s262_s8] sm:$0xff]  ;;  %v294_v12 = vld [vmem:[%s262_s8 + $0x8] sm:$0xff]  ;;  %v295_v13 = vld [vmem:[%s262_s8 + $0x10] sm:$0xff] }
  0x10   : > { %v297_v14 = vunpack.c.l.bf16 %v293_v11  ;;  %v298_v15 = vunpack.c.h.bf16 %v293_v11  ;;  %v296_v16 = vld [vmem:[%s262_s8 + $0x18] sm:$0xff]  ;;  %v299_v17 = vunpack.c.l.bf16 %v294_v12  ;;  %v300_v18 = vunpack.c.h.bf16 %v294_v12 }
  0x11   : > { %v301_v21 = vunpack.c.l.bf16 %v295_v13  ;;  %v302_v22 = vunpack.c.h.bf16 %v295_v13  ;;  %v303_v23 = vunpack.c.l.bf16 %v296_v16  ;;  %v304_v24 = vunpack.c.h.bf16 %v296_v16 }
  0x12   : > { %326 = vperm.xlu1 %571, %v308_v3   ;;  %316 = vperm.xlu0 %570, %v306_v4  }
  0x16   : > { %348 = vperm.xlu1 %571, %v338_v5   ;;  %343 = vperm.xlu0 %570, %v337_v6  }
  0x1a   : > { %358 = vperm.xlu1 %571, %v340_v7   ;;  %353 = vperm.xlu0 %570, %v339_v8  }
  0x89   : > { %v322_v9 = vpop.permute.xlu1 %321  ;;  %v312_v10 = vpop.permute.xlu0 %311 }
  0x8a   : > { %v329_v25 = vmul.f32 %v312_v10, %v297_v14  ;;  %v330_v26 = vmul.f32 %v312_v10, %v298_v15  ;;  %v333_v35 = vmul.f32 %v322_v9, %v301_v21  ;;  %v334_v36 = vmul.f32 %v322_v9, %v302_v22 }
  0x8d   : > { %v327_v19 = vpop.permute.xlu1 %326  ;;  %v317_v20 = vpop.permute.xlu0 %316 }
  0x8e   : > { %v331_v27 = vmul.f32 %v317_v20, %v299_v17  ;;  %v332_v28 = vmul.f32 %v317_v20, %v300_v18  ;;  %v335_v37 = vmul.f32 %v327_v19, %v303_v23  ;;  %v336_v38 = vmul.f32 %v327_v19, %v304_v24 }
  0x91   : > { %v349_v29 = vpop.permute.xlu1 %348  ;;  %v344_v30 = vpop.permute.xlu0 %343 }
  0x92   : > { %v363_v31 = vadd.f32 %v349_v29, %v331_v27  ;;  %v364_v32 = vadd.f32 %v349_v29, %v332_v28  ;;  %v361_v33 = vadd.f32 %v344_v30, %v329_v25  ;;  %v362_v34 = vadd.f32 %v344_v30, %v330_v26 }
  0x94   : > { %v371_v39 = vmax.f32 %v363_v31, 0.0  ;;  %v372_v40 = vmax.f32 %v364_v32, 0.0  ;;  %v369_v41 = vmax.f32 %v361_v33, 0.0  ;;  %v370_v42 = vmax.f32 %v362_v34, 0.0 }
  0x95   : > { %v359_v43 = vpop.permute.xlu1 %358  ;;  %v354_v44 = vpop.permute.xlu0 %353 }
  0x96   : > { %379 = vst [vmem:[%s290_s16 + $0x10] sm:$0xff] %v371_v39  ;;  %380 = vst [vmem:[%s290_s16 + $0x18] sm:$0xff] %v372_v40  ;;  %v367_v45 = vadd.f32 %v359_v43, %v335_v37  ;;  %v368_v46 = vadd.f32 %v359_v43, %v336_v38  ;;  %v365_v47 = vadd.f32 %v354_v44, %v333_v35 }
  0x97   : > { %377 = vst [vmem:[%s290_s16] sm:$0xff] %v369_v41  ;;  %378 = vst [vmem:[%s290_s16 + $0x8] sm:$0xff] %v370_v42  ;;  %v366_v48 = vadd.f32 %v354_v44, %v334_v36 }
  0x98   : > { %v375_v49 = vmax.f32 %v367_v45, 0.0  ;;  %v376_v50 = vmax.f32 %v368_v46, 0.0  ;;  %v373_v51 = vmax.f32 %v365_v47, 0.0 }
  0x99   : > { %v374_v52 = vmax.f32 %v366_v48, 0.0 }
  0x9a   : > { %383 = vst [vmem:[%s290_s16 + $0x30] sm:$0xff] %v375_v49  ;;  %384 = vst [vmem:[%s290_s16 + $0x38] sm:$0xff] %v376_v50 }
  0x9b   : > { %381 = vst [vmem:[%s290_s16 + $0x20] sm:$0xff] %v373_v51  ;;  %382 = vst [vmem:[%s290_s16 + $0x28] sm:$0xff] %v374_v52 }
  0x9c PF: > { %s13_s14 = sadd.s32 1, %s594_s14   ;;  %s686_s12 = smov %s590_s13 }
  0x9d   : > { %p10_p5 = scmp.ge.s32.totalorder %s13_s14, 4   ;;  %s687_s13 = smov %s689_s15 }
  0x9f   :  { %12 = sbr.rel (!%p10_p5) target bundleno = 2 (0x2), region = 68 }

// kernel: convbnrelu_forward.2
= control target key start
LH: loop header
LB: loop body
LE: loop exit
PB: predicated region body
PF: predicated region fallthrough
CT: control target
= control target key end

     0   :  { %s1111_s18 = smov 0   ;;  %s1113_s19 = smov 0   ;;  %s1192_s0 = inlined_call_operand.vmem [shape: bf16[32,48], index: 0, kind: input, shape index: {}]   ;;  %s1193_s1 = inlined_call_operand.vmem [shape: bf16[2,48,256], index: 1, kind: input, shape index: {}]   ;;  %s1194_s2 = inlined_call_operand.vmem [shape: f32[32,1], index: 2, kind: input, shape index: {}]   ;;  %s1195_s3 = inlined_call_operand.vmem [shape: bf16[2,32,256], index: 3, kind: output, shape index: {0}]   ;;  %s1196_s4 = inlined_call_operand.vmem [shape: f32[2,1,32,1], index: 4, kind: output, shape index: {1}]   ;;  %s1197_s5 = inlined_call_operand.vmem [shape: f32[2,1,32,1], index: 5, kind: output, shape index: {2}]  }
   0x1   :  { %s1115_s20 = smov 0  }
   0x2 LB: > { %s42_s21 = sadd.s32 1, %s1074_s19  ;;  %p980_p0 = scmp.ge.s32.totalorder %s1078_s20, 1  ;;  %s1078_s20 = sphi %s1115_s20, %s16_s20   ;;  %s1074_s19 = sphi %s1113_s19, %s1199_s19   ;;  %s1070_s18 = sphi %s1111_s18, %s1198_s18  }
   0x3   : > { %p44_p1 = scmp.ge.s32.totalorder %s42_s21, 2  ;;  %p272_p2 = scmp.lt.s32.totalorder %s1078_s20, 3 }
   0x5   : > { %s1201_s21 = smov (%p44_p1, %s42_s21), 0  ;;  %p273_p3 = pnand %p980_p0, %p272_p2 }
   0x6   : > { %p368_p4 = scmp.lt.s32.totalorder (!%p273_p3), %s1070_s18, 1 }
   0x7   : > { %276 = sbr.rel (%p273_p3) target bundleno = 438 (0x1b6), region = 32 }
   0xc   : > { %v1080_v0 = vmov 0   ;;  %s1203_s18 = smov (!%p368_p4, %s1070_s18), 1  ;;  %v1054_v7 = vld [vmem:[%s1192_s0] sm:$0xff]   ;;  %v1055_v8 = vld [vmem:[%s1192_s0 + $0x8] sm:$0xff]   ;;  %vm503_vm0 = vcmask 392192   ;;  %v592_v25 = vld [vmem:[%s1194_s2 + $0x10] sm:$0xff] }
   0xd   : > { %542 = vmatprep.mubr.bf16.mxu0 %v1080_v0  ;;  %552 = vmatprep.mubr.bf16.mxu1 %v1080_v0  ;;  %s1017_s22 = smul.u32 48, %s1203_s18  ;;  %v591_v24 = vld [vmem:[%s1194_s2 + $0x8] sm:$0xff]  ;;  %v590_v26 = vld [vmem:[%s1194_s2] sm:$0xff]  ;;  %v593_v36 = vld [vmem:[%s1194_s2 + $0x18] sm:$0xff]  ;;  %s1004_s13 = sshll.u32 %s1203_s18, 5  ;;  %vm662_vm1 = vcmask 7168  }
   0xe   : > { %1044 = vset.pattern.permute.xlu1 %v1080_v0  ;;  %1043 = vset.pattern.permute.xlu0 %v1080_v0  ;;  %s416_s16 = scalar_lea.vmem %s1196_s4, %s1004_s13  ;;  %s430_s23 = scalar_lea.vmem %s1197_s5, %s1004_s13 }
   0xf   : > { %s379_s25 = scalar_lea.vmem %s1193_s1, %s1017_s22 }
  0x10   : > { %v1045_v1 = vld [vmem:[%s379_s25 + $0x24] ss:$8 sps:$4 sm:$0xff]   ;;  %v1047_v2 = vld [vmem:[%s379_s25 + $0x20] ss:$8 sps:$4 sm:$0xff]   ;;  %v1048_v3 = vld [vmem:[%s379_s25 + $0x14] ss:$8 sps:$4 sm:$0xff]  }
  0x11   : > { %520 = vmatprep.subr.bf16.mxu0 %v1045_v1  ;;  %1011 = vmatprep.subr.bf16.mxu1 %v1045_v1  ;;  %v1050_v4 = vld [vmem:[%s379_s25 + $0x10] ss:$8 sps:$4 sm:$0xff]   ;;  %v1051_v5 = vld [vmem:[%s379_s25 + $0x4] ss:$8 sps:$4 sm:$0xff]   ;;  %v1053_v6 = vld [vmem:[%s379_s25] ss:$8 sps:$4 sm:$0xff]   ;;  %s401_s25 = scalar_lea.vmem %s1195_s3, %s1004_s13 }
  0x12   : > { %521 = vmatpush1.bf16.msra.mxu0 %v1047_v2  ;;  %1014 = vmatpush1.bf16.msra.mxu1 %v1047_v2 }
  0x13   : > { %522 = vmatprep.subr.bf16.mxu0 %v1048_v3  ;;  %1012 = vmatprep.subr.bf16.mxu1 %v1048_v3 }
  0x16   : > { %523 = vmatpush1.bf16.msra.mxu0 %v1050_v4  ;;  %1015 = vmatpush1.bf16.msra.mxu1 %v1050_v4 }
  0x17   : > { %524 = vmatprep.subr.bf16.mxu0 %v1051_v5  ;;  %1013 = vmatprep.subr.bf16.mxu1 %v1051_v5 }
  0x1a   : > { %525 = vmatpush1.bf16.msra.mxu0 %v1053_v6  ;;  %1016 = vmatpush1.bf16.msra.mxu1 %v1053_v6 }
  0x1d   : > { %996 = vmatmul.mubr.msk.bf16.vlgmr.msra.gmra.mxu0 %vm503_vm0, %v1054_v7  ;;  %997 = vmatmul.mubr.msk.bf16.vlgmr.msra.gmra.mxu1 %vm503_vm0, %v1055_v8 }
  0xdd   : > { %v1141_v9 = vpop.f32.mrf.mxu0  ;;  %v554_v10 = vpop.f32.mrf.mxu1 }
  0xde   : > { %v667_v11 = vmul.f32 %v1141_v9, %v1141_v9  ;;  %v671_v20 = vmul.f32 %v554_v10, %v554_v10 }
  0xdf   : > { %v1145_v12 = vpop.f32.mrf.mxu0  ;;  %v556_v13 = vpop.f32.mrf.mxu1 }
  0xe0   : > { %v656_v14 = vadd.f32 %v556_v13, %v554_v10  ;;  %v650_v15 = vadd.f32 %v1145_v12, %v1141_v9  ;;  %v668_v16 = vmul.f32 %v1145_v12, %v1145_v12  ;;  %v672_v19 = vmul.f32 %v556_v13, %v556_v13 }
  0xe1   : > { %v548_v18 = vpop.f32.mrf.mxu0  ;;  %v558_v27 = vpop.f32.mrf.mxu1 }
  0xe2   : > { %657 = vadd.xlane.f32.xlu1 %v656_v14  ;;  %651 = vadd.xlane.f32.xlu0 %v650_v15  ;;  %v675_v17 = vadd.f32 %v668_v16, %v667_v11  ;;  %v681_v22 = vadd.f32 %v672_v19, %v671_v20  ;;  %v669_v31 = vmul.f32 %v548_v18, %v548_v18 }
  0xe3   : > { %v550_v21 = vpop.f32.mrf.mxu0  ;;  %v560_v28 = vpop.f32.mrf.mxu1  ;;  %v673_v34 = vmul.f32 %v558_v27, %v558_v27 }
  0xe4   : > { %v653_v23 = vadd.f32 %v550_v21, %v548_v18  ;;  %v670_v29 = vmul.f32 %v550_v21, %v550_v21  ;;  %v659_v30 = vadd.f32 %v560_v28, %v558_v27  ;;  %v674_v32 = vmul.f32 %v560_v28, %v560_v28 }
  0xe6   : > { %676 = vadd.xlane.f32.xlu0 %v675_v17  ;;  %v678_v33 = vadd.f32 %v670_v29, %v669_v31  ;;  %v684_v35 = vadd.f32 %v674_v32, %v673_v34 }
  0xea   : > { %682 = vadd.xlane.f32.xlu0 %v681_v22 }
  0xee   : > { %654 = vadd.xlane.f32.xlu0 %v653_v23 }
  0xf3   : > { %601 = vperm.xlu1 %1044, %v591_v24  }
  0xf7   : > { %606 = vperm.xlu1 %1044, %v592_v25  }
 0x104   : > { %596 = vperm.xlu0 %1043, %v590_v26  }
 0x11b   : > { %660 = vadd.xlane.f32.xlu1 %v659_v30 }
 0x11f   : > { %679 = vadd.xlane.f32.xlu1 %v678_v33 }
 0x123   : > { %685 = vadd.xlane.f32.xlu1 %v684_v35 }
 0x134   : > { %611 = vperm.xlu1 %1044, %v593_v36  }
 0x16b   : > { %v658_v37 = vpop.xlane.xlu1 %657  ;;  %v652_v38 = vpop.xlane.xlu0 %651 }
 0x16c   : > { %665 = vst.msk [vmem:[%s416_s16 + $0x10] sm:$0xff] %vm662_vm1, %v658_v37  ;;  %663 = vst.msk [vmem:[%s416_s16] sm:$0xff] %vm662_vm1, %v652_v38 }
 0x16f   : > { %v602_v39 = vpop.permute.xlu1 %601  ;;  %v677_v40 = vpop.xlane.xlu0 %676 }
 0x170   : > { %v616_v41 = vadd.f32 %v602_v39, %v548_v18  ;;  %v617_v42 = vadd.f32 %v602_v39, %v550_v21  ;;  %687 = vst.msk [vmem:[%s430_s23] sm:$0xff] %vm662_vm1, %v677_v40 }
 0x172   : > { %v1008_v43 = vpack.c.bf16 %v617_v42, %v616_v41 }
 0x173   : > { %v607_v44 = vpop.permute.xlu1 %606  ;;  %v683_v45 = vpop.xlane.xlu0 %682 }
 0x174   : > { %647 = vst [vmem:[%s401_s25 + $0x8] sm:$0xff] %v1008_v43  ;;  %v618_v46 = vadd.f32 %v607_v44, %v554_v10  ;;  %v619_v47 = vadd.f32 %v607_v44, %v556_v13  ;;  %689 = vst.msk [vmem:[%s430_s23 + $0x10] sm:$0xff] %vm662_vm1, %v683_v45 }
 0x176   : > { %v1009_v48 = vpack.c.bf16 %v619_v47, %v618_v46 }
 0x177   : > { %v655_v49 = vpop.xlane.xlu0 %654 }
 0x178   : > { %648 = vst [vmem:[%s401_s25 + $0x10] sm:$0xff] %v1009_v48  ;;  %664 = vst.msk [vmem:[%s416_s16 + $0x8] sm:$0xff] %vm662_vm1, %v655_v49 }
 0x17f   : > { %v597_v50 = vpop.permute.xlu0 %596 }
 0x180   : > { %v614_v51 = vadd.f32 %v597_v50, %v1141_v9  ;;  %v615_v52 = vadd.f32 %v597_v50, %v1145_v12 }
 0x182   : > { %v1007_v53 = vpack.c.bf16 %v615_v52, %v614_v51 }
 0x184   : > { %646 = vst [vmem:[%s401_s25] sm:$0xff] %v1007_v53 }
 0x1a4   : > { %v661_v54 = vpop.xlane.xlu1 %660 }
 0x1a5   : > { %666 = vst.msk [vmem:[%s416_s16 + $0x18] sm:$0xff] %vm662_vm1, %v661_v54 }
 0x1a8   : > { %v680_v55 = vpop.xlane.xlu1 %679 }
 0x1a9   : > { %688 = vst.msk [vmem:[%s430_s23 + $0x8] sm:$0xff] %vm662_vm1, %v680_v55 }
 0x1ac   : > { %v686_v56 = vpop.xlane.xlu1 %685 }
 0x1ad   : > { %690 = vst.msk [vmem:[%s430_s23 + $0x18] sm:$0xff] %vm662_vm1, %v686_v56 }
 0x1b0   : > { %v612_v57 = vpop.permute.xlu1 %611 }
 0x1b1   : > { %v620_v58 = vadd.f32 %v612_v57, %v558_v27  ;;  %v621_v59 = vadd.f32 %v612_v57, %v560_v28 }
 0x1b3   : > { %v1010_v60 = vpack.c.bf16 %v621_v59, %v620_v58 }
 0x1b5   : > { %649 = vst [vmem:[%s401_s25 + $0x18] sm:$0xff] %v1010_v60 }
 0x1b6 PF: > { %s16_s20 = sadd.s32 1, %s1078_s20   ;;  %s1198_s18 = smov %s1074_s19 }
 0x1b7   : > { %p13_p5 = scmp.ge.s32.totalorder %s16_s20, 4   ;;  %s1199_s19 = smov %s1201_s21 }
 0x1b9   :  { %15 = sbr.rel (!%p13_p5) target bundleno = 2 (0x2), region = 100 }

</bundles_post_ra>
